<compile_context>
chip_gen: v7x
topology: tpu7x:2x2x1
jax: 0.10.0
libtpu: 0.0.40
codegen_flags: <defaults>
</compile_context>

<pallas_src>
import math

import jax
import jax.numpy as jnp
from jax.experimental import pallas as pl
from jax.experimental.pallas import tpu as pltpu


def _round_up(x, mult):
    return (x + mult - 1) // mult * mult


def _make_arcmargin_kernel(s, cos_m, sin_m, th, mm, easy_margin, compute_dtype):
    def kernel(w_ref, x_ref, inv_xn_ref, label_ref, o_ref):
        j = pl.program_id(0)  # class-tile index (outer axis) -> global class offset

        w = w_ref[...]
        if w.dtype != compute_dtype:
            w = w.astype(compute_dtype)            # (TC, D)
        xc = x_ref[...].astype(compute_dtype)      # (TN, D)

        # cosine = (x @ w_norm^T) * (1/||x||); both operands contract on their
        # last (lane) dim so the MXU gets them with no XLU transpose.
        dots = jax.lax.dot_general(
            xc, w,
            dimension_numbers=(((1,), (1,)), ((), ())),
            preferred_element_type=jnp.float32)                      # (TN, TC) f32
        cosine = dots * inv_xn_ref[...]                              # (TN,1) row scale

        # sine = sqrt(max(1 - cos^2, 0)); phi = cos(theta + m).
        # (Upper clamp of the reference's clamp(.,0,1) is mathematically
        #  redundant since 1 - cos^2 <= 1.)
        sine = jnp.sqrt(jnp.maximum(1.0 - cosine * cosine, 0.0))
        phi = cosine * cos_m - sine * sin_m
        if easy_margin:
            phi = jnp.where(cosine > 0.0, phi, cosine)
        else:
            phi = jnp.where(cosine > th, phi, cosine - mm)

        # One-hot "scatter" via a (1, TC) iota of global class ids compared
        # against the (TN, 1) labels (broadcasts to (TN, TC) bool).
        tc = cosine.shape[1]
        cls_ids = jax.lax.broadcasted_iota(jnp.int32, (1, tc), 1) + j * tc
        one_hot = cls_ids == label_ref[...]

        o_ref[...] = (jnp.where(one_hot, phi, cosine) * s).astype(o_ref.dtype)

    return kernel


def arc_margin_product(x, weight, label, *, s=30.0, m=0.5, easy_margin=False,
                       block_n=256, block_c=1024,
                       compute_dtype=jnp.bfloat16,
                       weight_dtype=None,
                       out_dtype=jnp.float32):
    """ArcFace margin logits.

    Args:
      x:      (N, D) float features.
      weight: (C, D) float class weights.
      label:  (N,)   int class ids in [0, C).
      block_n / block_c: row / class tile sizes (rounded to 8 / 128).
      compute_dtype: MXU input dtype (default bf16; accumulation stays f32).
      weight_dtype:  dtype of the pre-normalized weight streamed from HBM
        (default: same as compute_dtype; bf16 halves the dominant HBM stream).
      out_dtype: logits dtype (default f32; bf16 halves the output stream).
    Returns:
      logits: (N, C) out_dtype.
    """
    if weight_dtype is None:
        weight_dtype = compute_dtype

    n, d = x.shape
    c, d2 = weight.shape
    assert d == d2, "feature dims must match"

    eps = 1e-12  # matches torch.nn.functional.normalize default eps

    # --- Wrapper-side precompute (one pass over x and W, in f32). ----------
    x32 = x.astype(jnp.float32)
    w32 = weight.astype(jnp.float32)
    # 1 / max(||v||, eps) == rsqrt(max(sum(v^2), eps^2))  (F.normalize semantics)
    inv_xn = jax.lax.rsqrt(
        jnp.maximum(jnp.sum(x32 * x32, axis=1, keepdims=True), eps * eps))  # (N,1)
    inv_wn = jax.lax.rsqrt(
        jnp.maximum(jnp.sum(w32 * w32, axis=1, keepdims=True), eps * eps))  # (C,1)
    w_n = (w32 * inv_wn).astype(weight_dtype)                               # (C,D)

    # --- Tile sizes: lane-dense class tile (mult of 128), sublane-dense row
    # tile (mult of 8), clipped to the (padded) problem size.
    tn = min(_round_up(max(block_n, 8), 8), _round_up(n, 8))
    tc = min(_round_up(max(block_c, 128), 128), _round_up(c, 128))

    n_pad = _round_up(n, tn)
    c_pad = _round_up(c, tc)

    x_p = x32 if n_pad == n else jnp.pad(x32, ((0, n_pad - n), (0, 0)))
    inv_xn_p = inv_xn if n_pad == n else jnp.pad(inv_xn, ((0, n_pad - n), (0, 0)))
    w_p = w_n if c_pad == c else jnp.pad(w_n, ((0, c_pad - c), (0, 0)))
    label_p = label.astype(jnp.int32)
    if n_pad != n:
        # Padded rows get label -1, which never matches any class id.
        label_p = jnp.pad(label_p, (0, n_pad - n), constant_values=-1)
    label2d = label_p.reshape(n_pad, 1)

    cos_m = math.cos(m)
    sin_m = math.sin(m)
    th = math.cos(math.pi - m)
    mm = math.sin(math.pi - m) * m

    kernel = _make_arcmargin_kernel(s, cos_m, sin_m, th, mm, easy_margin,
                                    compute_dtype)

    grid_c = c_pad // tc
    grid_n = n_pad // tn
    grid = (grid_c, grid_n)  # class tiles OUTER -> weight DMA'd once per stripe

    w_item = jnp.dtype(weight_dtype).itemsize
    out_item = jnp.dtype(out_dtype).itemsize

    # Advisory cost hint: weight streamed once, x/inv_xn/label re-streamed per
    # class stripe (small), logits written once.
    cost = pl.CostEstimate(
        flops=2 * n_pad * c_pad * d,
        transcendentals=n_pad * c_pad,
        bytes_accessed=(c_pad * d * w_item
                        + grid_c * n_pad * (d + 2) * 4
                        + n_pad * c_pad * out_item),
    )

    # Double-buffered working set (generation-aware cap; never request the
    # whole physical VMEM — v7x only has 64 MiB per TensorCore).
    work_set = (2 * tc * d * w_item          # weight tile
                + 2 * tn * d * 4             # x tile
                + 2 * tn * tc * out_item     # output tile
                + 4 * tn * 128 * 4)          # inv_xn + label tiles (lane-padded)
    try:
        phys_vmem = getattr(pltpu.get_tpu_info(), "vmem_capacity_bytes",
                            64 * 1024 * 1024)
    except Exception:  # pragma: no cover - conservative fallback
        phys_vmem = 64 * 1024 * 1024
    vmem_cap = (phys_vmem * 4) // 5  # leave >= 20% headroom for the compiler
    vmem_limit = int(min(vmem_cap, max(32 * 1024 * 1024, 2 * work_set)))

    out = pl.pallas_call(
        kernel,
        out_shape=jax.ShapeDtypeStruct((n_pad, c_pad), out_dtype),
        grid_spec=pltpu.PrefetchScalarGridSpec(
            num_scalar_prefetch=0,
            grid=grid,
            in_specs=[
                # Weight: block index depends only on the OUTER (class) axis,
                # so its DMA is skipped across the inner row loop.
                pl.BlockSpec((tc, d), lambda j, i: (j, 0)),
                pl.BlockSpec((tn, d), lambda j, i: (i, 0)),   # x row tile
                pl.BlockSpec((tn, 1), lambda j, i: (i, 0)),   # 1/||x|| row tile
                pl.BlockSpec((tn, 1), lambda j, i: (i, 0)),   # labels row tile
            ],
            out_specs=pl.BlockSpec((tn, tc), lambda j, i: (i, j)),
        ),
        compiler_params=pltpu.CompilerParams(
            dimension_semantics=("parallel", "parallel"),
            vmem_limit_bytes=vmem_limit,
        ),
        cost_estimate=cost,
    )(w_p, x_p, inv_xn_p, label2d)

    return out[:n, :c]


def _reference(x, weight, label, *, s=30.0, m=0.5, easy_margin=False):
    """Pure-JAX reference mirroring the PyTorch forward, for verification."""
    eps = 1e-12
    cos_m, sin_m = math.cos(m), math.sin(m)
    th = math.cos(math.pi - m)
    mm = math.sin(math.pi - m) * m
    x_n = x / jnp.maximum(jnp.linalg.norm(x, axis=1, keepdims=True), eps)
    w_n = weight / jnp.maximum(jnp.linalg.norm(weight, axis=1, keepdims=True), eps)
    cosine = x_n @ w_n.T
    sine = jnp.sqrt(jnp.clip(1.0 - cosine**2, 0.0, 1.0))
    phi = cosine * cos_m - sine * sin_m
    if easy_margin:
        phi = jnp.where(cosine > 0, phi, cosine)
    else:
        phi = jnp.where(cosine > th, phi, cosine - mm)
    one_hot = jax.nn.one_hot(label, weight.shape[0], dtype=cosine.dtype)
    return (one_hot * phi + (1.0 - one_hot) * cosine) * s


if __name__ == "__main__":
    key = jax.random.PRNGKey(0)

    # --- Small shapes consistent with the module (N = S*U utterances). -----
    N, D, C = 8, 32, 8
    kx, kw, kl = jax.random.split(key, 3)
    x = jax.random.normal(kx, (N, D), dtype=jnp.float32)
    bound = math.sqrt(6.0 / (D + C))  # Xavier-uniform init for (C, D) weight
    weight = jax.random.uniform(kw, (C, D), minval=-bound, maxval=bound,
                                dtype=jnp.float32)
    label = jax.random.randint(kl, (N,), 0, C, dtype=jnp.int32)
    ref = _reference(x, weight, label, s=30.0, m=0.5, easy_margin=False)

    # f32 path: matches the PyTorch reference tightly.
    logits = arc_margin_product(x, weight, label, s=30.0, m=0.5,
                                easy_margin=False,
                                compute_dtype=jnp.float32,
                                weight_dtype=jnp.float32)
    logits = jax.block_until_ready(logits)
    assert logits.shape == (N, C)
    assert jnp.allclose(logits, ref, atol=2e-4, rtol=2e-4), "mismatch (f32)"

    # Default (bf16 MXU inputs, f32 accumulation): looser tolerance by design.
    logits_bf16 = jax.block_until_ready(
        arc_margin_product(x, weight, label, s=30.0, m=0.5, easy_margin=False))
    assert jnp.allclose(logits_bf16, ref, atol=0.5, rtol=0.05), "mismatch (bf16)"

    # easy_margin branch (f32 path).
    logits_em = jax.block_until_ready(
        arc_margin_product(x, weight, label, s=30.0, m=0.5, easy_margin=True,
                           compute_dtype=jnp.float32,
                           weight_dtype=jnp.float32))
    ref_em = _reference(x, weight, label, s=30.0, m=0.5, easy_margin=True)
    assert jnp.allclose(logits_em, ref_em, atol=2e-4, rtol=2e-4), \
        "mismatch (easy_margin)"

    # --- Exercise the flipped tiled grid + padding path (ragged N/C). ------
    N2, D2, C2 = 40, 64, 300
    kx2, kw2, kl2 = jax.random.split(jax.random.PRNGKey(1), 3)
    x2 = jax.random.normal(kx2, (N2, D2), dtype=jnp.float32)
    bound2 = math.sqrt(6.0 / (D2 + C2))
    weight2 = jax.random.uniform(kw2, (C2, D2), minval=-bound2, maxval=bound2,
                                 dtype=jnp.float32)
    label2 = jax.random.randint(kl2, (N2,), 0, C2, dtype=jnp.int32)

    logits2 = arc_margin_product(x2, weight2, label2, s=30.0, m=0.5,
                                 easy_margin=False, block_n=16, block_c=128,
                                 compute_dtype=jnp.float32,
                                 weight_dtype=jnp.float32)
    logits2 = jax.block_until_ready(logits2)
    ref2 = _reference(x2, weight2, label2, s=30.0, m=0.5, easy_margin=False)
    assert logits2.shape == (N2, C2)
    assert jnp.allclose(logits2, ref2, atol=2e-4, rtol=2e-4), "mismatch (tiled)"

    print("KERNEL_OK")
</pallas_src>

<mosaic_0001>
module attributes {stable_mosaic.version = 11 : i64} {
  func.func @kernel(%arg0: i32, %arg1: i32, %arg2: memref<128x32xf32, #tpu.memory_space<vmem>>, %arg3: memref<8x32xf32, #tpu.memory_space<vmem>>, %arg4: memref<8x1xf32, #tpu.memory_space<vmem>>, %arg5: memref<8x1xi32, #tpu.memory_space<vmem>>, %arg6: memref<8x128xf32, #tpu.memory_space<vmem>>) attributes {dimension_semantics = [#tpu.dimension_semantics<parallel>, #tpu.dimension_semantics<parallel>], iteration_bounds = array<i64: 1, 1>, scalar_prefetch = 0 : i64, scratch_operands = 0 : i64, tpu.core_type = #tpu.core_type<tc>, window_params = [{transform_indices = @transform_0, window_bounds = array<i64: 128, 32>}, {transform_indices = @transform_1, window_bounds = array<i64: 8, 32>}, {transform_indices = @transform_2, window_bounds = array<i64: 8, 1>}, {transform_indices = @transform_3, window_bounds = array<i64: 8, 1>}, {transform_indices = @transform_4, window_bounds = array<i64: 8, 128>}]} {
    %c0 = arith.constant 0 : index
    %c0_0 = arith.constant 0 : index
    %0 = vector.load %arg2[%c0, %c0_0] : memref<128x32xf32, #tpu.memory_space<vmem>>, vector<128x32xf32>
    %c0_1 = arith.constant 0 : index
    %c0_2 = arith.constant 0 : index
    %1 = vector.load %arg3[%c0_1, %c0_2] : memref<8x32xf32, #tpu.memory_space<vmem>>, vector<8x32xf32>
    %cst = arith.constant dense<0.000000e+00> : vector<8x128xf32>
    %2 = tpu.matmul %1, %0, %cst {dimension_numbers = #tpu.dot_dimension_numbers<[1], [1], [0], [0], [0, 0, 1, 0], [], []>} : vector<8x32xf32>, vector<128x32xf32>, vector<8x128xf32> -> vector<8x128xf32>
    %c0_3 = arith.constant 0 : index
    %c0_4 = arith.constant 0 : index
    %3 = vector.load %arg4[%c0_3, %c0_4] : memref<8x1xf32, #tpu.memory_space<vmem>>, vector<8x1xf32>
    %4 = vector.broadcast %3 : vector<8x1xf32> to vector<8x128xf32>
    %5 = arith.mulf %2, %4 : vector<8x128xf32>
    %6 = arith.mulf %5, %5 : vector<8x128xf32>
    %cst_5 = arith.constant 1.000000e+00 : f32
    %7 = vector.broadcast %cst_5 : f32 to vector<8x128xf32>
    %8 = arith.subf %7, %6 : vector<8x128xf32>
    %cst_6 = arith.constant 0.000000e+00 : f32
    %9 = vector.broadcast %cst_6 : f32 to vector<8x128xf32>
    %10 = arith.maximumf %8, %9 : vector<8x128xf32>
    %11 = math.sqrt %10 : vector<8x128xf32>
    %cst_7 = arith.constant 0.87758255 : f32
    %12 = vector.broadcast %cst_7 : f32 to vector<8x128xf32>
    %13 = arith.mulf %5, %12 : vector<8x128xf32>
    %cst_8 = arith.constant 0.47942555 : f32
    %14 = vector.broadcast %cst_8 : f32 to vector<8x128xf32>
    %15 = arith.mulf %11, %14 : vector<8x128xf32>
    %16 = arith.subf %13, %15 : vector<8x128xf32>
    %cst_9 = arith.constant -0.87758255 : f32
    %17 = vector.broadcast %cst_9 : f32 to vector<8x128xf32>
    %18 = arith.cmpf ogt, %5, %17 : vector<8x128xf32>
    %cst_10 = arith.constant 0.239712775 : f32
    %19 = vector.broadcast %cst_10 : f32 to vector<8x128xf32>
    %20 = arith.subf %5, %19 : vector<8x128xf32>
    %21 = arith.select %18, %16, %20 : vector<8x128xi1>, vector<8x128xf32>
    %22 = tpu.iota {dimensions = array<i32: 1>} : vector<1x128xi32>
    %c128_i32 = arith.constant 128 : i32
    %23 = arith.muli %arg0, %c128_i32 : i32
    %24 = vector.broadcast %23 : i32 to vector<1x128xi32>
    %25 = arith.addi %22, %24 : vector<1x128xi32>
    %c0_11 = arith.constant 0 : index
    %c0_12 = arith.constant 0 : index
    %26 = vector.load %arg5[%c0_11, %c0_12] : memref<8x1xi32, #tpu.memory_space<vmem>>, vector<8x1xi32>
    %27 = vector.broadcast %25 : vector<1x128xi32> to vector<8x128xi32>
    %28 = vector.broadcast %26 : vector<8x1xi32> to vector<8x128xi32>
    %29 = arith.cmpi eq, %27, %28 : vector<8x128xi32>
    %30 = arith.select %29, %21, %5 : vector<8x128xi1>, vector<8x128xf32>
    %cst_13 = arith.constant 3.000000e+01 : f32
    %31 = vector.broadcast %cst_13 : f32 to vector<8x128xf32>
    %32 = arith.mulf %30, %31 : vector<8x128xf32>
    %c0_14 = arith.constant 0 : index
    %c0_15 = arith.constant 0 : index
    %33 = vector.load %arg6[%c0_14, %c0_15] : memref<8x128xf32, #tpu.memory_space<vmem>>, vector<8x128xf32>
    tpu.vector_store %arg6[%c0_14, %c0_15], %32 {strides = array<i32>} : memref<8x128xf32, #tpu.memory_space<vmem>>, vector<8x128xf32>,
    return
  }
  func.func @transform_0(%arg0: i32, %arg1: i32) -> (i32, i32) {
    %c0_i32 = arith.constant 0 : i32
    %c0_i32_0 = arith.constant 0 : i32
    return %arg0, %c0_i32 : i32, i32
  }
  func.func @transform_1(%arg0: i32, %arg1: i32) -> (i32, i32) {
    %c0_i32 = arith.constant 0 : i32
    %c0_i32_0 = arith.constant 0 : i32
    return %arg1, %c0_i32 : i32, i32
  }
  func.func @transform_2(%arg0: i32, %arg1: i32) -> (i32, i32) {
    %c0_i32 = arith.constant 0 : i32
    %c0_i32_0 = arith.constant 0 : i32
    return %arg1, %c0_i32 : i32, i32
  }
  func.func @transform_3(%arg0: i32, %arg1: i32) -> (i32, i32) {
    %c0_i32 = arith.constant 0 : i32
    %c0_i32_0 = arith.constant 0 : i32
    return %arg1, %c0_i32 : i32, i32
  }
  func.func @transform_4(%arg0: i32, %arg1: i32) -> (i32, i32) {
    %c0_i32 = arith.constant 0 : i32
    return %arg1, %arg0 : i32, i32
  }
}

</mosaic_0001>

<bundles_post_ra>
// kernel: tpu_custom_call.1
= control target key start
LH: loop header
LB: loop body
LE: loop exit
PB: predicated region body
PF: predicated region fallthrough
CT: control target
= control target key end

     0   :  { %vm35_vm0 = vcmask 261120   ;;  %v341_v2 = vmov 0.0|0.0   ;;  %vm342_vm2 = vmmov 0   ;;  %v343_v5 = vmov 0.0   ;;  %s463_s0 = inlined_call_operand.vmem [shape: f32[128,32], index: 0, kind: input, shape index: {}]   ;;  %s464_s1 = inlined_call_operand.vmem [shape: f32[8,32], index: 1, kind: input, shape index: {}]   ;;  %s465_s2 = inlined_call_operand.vmem [shape: f32[8,1], index: 2, kind: input, shape index: {}]   ;;  %s466_s3 = inlined_call_operand.vmem [shape: s32[8,1], index: 3, kind: input, shape index: {}]   ;;  %s467_s4 = inlined_call_operand.hbm [shape: f32[8,128], index: 4, kind: output, shape index: {}]  }
   0x1   :  { %v18_v0 = vld [vmem:[%s463_s0] sm:$0xff]  ;;  %v19_v1 = vld [vmem:[%s463_s0 + $0x8] sm:$0xff]  ;;  %277 = vmatprep.subr.bf16.mxu0 %v341_v2  ;;  %vm379_vm1 = vmpackc.low %vm35_vm0, %vm35_vm0  ;;  %274 = vmatprep.mubr.msk.f32.mxu0 %vm342_vm2, %v343_v5  ;;  %v344_v6 = vmov 0  }
   0x2   :  { %v278_v3 = vpack.c.bf16 %v19_v1, %v18_v0  ;;  %314 = vset.pattern.permute.xlu0 %v344_v6  ;;  %v20_v7 = vld [vmem:[%s463_s0 + $0x10] sm:$0xff]  ;;  %v21_v8 = vld [vmem:[%s463_s0 + $0x18] sm:$0xff]  ;;  %v157_v9 = vld [vmem:[%s465_s2] sm:$0xff] }
   0x4   :  { %280 = vmatpush3.bf16.xpose.msk.msra.mxu0 %vm379_vm1, %v278_v3 }
   0x5   :  { %281 = vmatprep.subr.bf16.mxu0 %v341_v2 }
   0x6   :  { %9 = vsyncpa [#allocation3], 0  ;;  %v282_v10 = vpack.c.bf16 %v21_v8, %v20_v7  ;;  %160 = vperm.xlu0 %314, %v157_v9   ;;  %v185_v11 = vld [vmem:[%s466_s3] sm:$0xff]  ;;  %v23_v13 = vld [vmem:[%s463_s0 + $0x28] sm:$0xff]  ;;  %v180_v39 = vlaneseq }
   0x7   :  { %v22_v12 = vld [vmem:[%s463_s0 + $0x20] sm:$0xff]  ;;  %v24_v15 = vld [vmem:[%s463_s0 + $0x30] sm:$0xff]  ;;  %v25_v16 = vld [vmem:[%s463_s0 + $0x38] sm:$0xff] }
   0x8   :  { %v286_v14 = vpack.c.bf16 %v23_v13, %v22_v12  ;;  %v290_v17 = vpack.c.bf16 %v25_v16, %v24_v15  ;;  %v26_v18 = vld [vmem:[%s463_s0 + $0x40] sm:$0xff]  ;;  %v27_v19 = vld [vmem:[%s463_s0 + $0x48] sm:$0xff]  ;;  %v28_v21 = vld [vmem:[%s463_s0 + $0x50] sm:$0xff]  ;;  %v181_v44 = vand.u32 127, %v180_v39 }
   0x9   :  { %v294_v20 = vpack.c.bf16 %v27_v19, %v26_v18  ;;  %v29_v22 = vld [vmem:[%s463_s0 + $0x58] sm:$0xff]  ;;  %v30_v24 = vld [vmem:[%s463_s0 + $0x60] sm:$0xff]  ;;  %v31_v25 = vld [vmem:[%s463_s0 + $0x68] sm:$0xff] }
   0xa   :  { %187 = vperm.xlu0 %314, %v185_v11   ;;  %v298_v23 = vpack.c.bf16 %v29_v22, %v28_v21  ;;  %v302_v26 = vpack.c.bf16 %v31_v25, %v30_v24  ;;  %v32_v27 = vld [vmem:[%s463_s0 + $0x70] sm:$0xff]  ;;  %v33_v28 = vld [vmem:[%s463_s0 + $0x78] sm:$0xff]  ;;  %v34_v30 = vld [vmem:[%s464_s1] sm:$0xff]  ;;  %s345_s0 = smov [#allocation2]  }
   0xb   :  { %v306_v29 = vpack.c.bf16 %v33_v28, %v32_v27  ;;  %s199_s1 = sshll.u32 %s345_s0, 4  ;;  %s200_s1 = int_to_ptr.vmem [resolvable:$true] %s199_s1 }
   0xc   :  { %284 = vmatpush3.bf16.xpose.msk.msra.mxu0 %vm379_vm1, %v282_v10  ;;  %s317_s25 = scalar_lea.vmem %s200_s1, 128  ;;  %p322_p1 = scmp.lt.s32.totalorder %s200_s1, %s200_s1 }
   0xd   :  { %285 = vmatprep.subr.bf16.mxu0 %v341_v2  ;;  %p318_p0 = scmp.ne.s32.totalorder %s200_s1, %s317_s25  ;;  %p323_p2 = scmp.lt.s32.totalorder %s317_s25, %s317_s25 }
   0xf   :  { %p324_p3 = por %p323_p2, %p322_p1 }
  0x11   :  { %p325_p4 = pnand %p324_p3, %p318_p0 }
  0x14   :  { %288 = vmatpush3.bf16.xpose.msk.msra.mxu0 %vm379_vm1, %v286_v14 }
  0x15   :  { %289 = vmatprep.subr.bf16.mxu0 %v341_v2 }
  0x1c   :  { %292 = vmatpush3.bf16.xpose.msk.msra.mxu0 %vm379_vm1, %v290_v17 }
  0x1d   :  { %293 = vmatprep.subr.bf16.mxu0 %v341_v2 }
  0x24   :  { %296 = vmatpush3.bf16.xpose.msk.msra.mxu0 %vm379_vm1, %v294_v20 }
  0x25   :  { %297 = vmatprep.subr.bf16.mxu0 %v341_v2 }
  0x2c   :  { %300 = vmatpush3.bf16.xpose.msk.msra.mxu0 %vm379_vm1, %v298_v23 }
  0x2d   :  { %301 = vmatprep.subr.bf16.mxu0 %v341_v2 }
  0x34   :  { %304 = vmatpush3.bf16.xpose.msk.msra.mxu0 %vm379_vm1, %v302_v26 }
  0x35   :  { %305 = vmatprep.subr.bf16.mxu0 %v341_v2 }
  0x3c   :  { %308 = vmatpush3.bf16.xpose.msk.msra.mxu0 %vm379_vm1, %v306_v29 }
  0x43   :  { %275 = vmatmul.mubr.msk.f32.vlgmr.msra.gmra.mrb[0].mxu0 %vm35_vm0, %v34_v30 }
  0x85   :  { %v161_v31 = vpop.permute.xlu0 %160 }
  0x89   :  { %v188_v47 = vpop.permute.xlu0 %187 }
  0x8a   :  { %vm189_vm6 = vcmp.eq.s32.totalorder %v181_v44, %v188_v47 }
 0x116   :  { %v153_v32 = vpop.f32.mrb[0].mxu0 }
 0x117   :  { %v163_v33 = vmul.f32 %v161_v31, %v153_v32  ;;  %v276_v34 = vpop.f32.mrb[1].mxu0 }
 0x119   :  { %v164_v35 = vmul.f32 %v163_v33, %v163_v33  ;;  %v174_v45 = vmul.f32 0.87758255, %v163_v33  ;;  %v224_v49 = vadd.f32 -0.23971277, %v163_v33  ;;  %vm177_vm5 = vcmp.gt.f32.partialorder %v163_v33, -0.87758255 }
 0x11b   :  { %v165_v36 = vsub.f32 1.0, %v164_v35 }
 0x11d   :  { %v166_v37 = vmax.f32 %v165_v36, 0.0 }
 0x11f   :  { %315 = vrsqrt.f32 %v166_v37  ;;  %vm169_vm3 = vcmp.eq.f32.partialorder %v166_v37, inf  ;;  %v172_v41 = vand.u32 2147483648, %v166_v37  ;;  %vm171_vm4 = vcmp.eq.f32.partialorder %v166_v37, 0.0 }
 0x129   :  { %v316_v38 = vpop.eup %315 }
 0x12a   :  { %v168_v40 = vmul.f32 %v316_v38, %v166_v37 }
 0x12c   :  { %v170_v42 = vsel %vm169_vm3, %v166_v37, %v168_v40 }
 0x12d   :  { %v173_v43 = vsel %vm171_vm4, %v172_v41, %v170_v42 }
 0x12e   :  { %v175_v46 = vmul.f32 0.47942555, %v173_v43 }
 0x130   :  { %v176_v48 = vsub.f32 %v174_v45, %v175_v46 }
 0x132   :  { %v179_v50 = vsel %vm177_vm5, %v176_v48, %v224_v49 }
 0x133   :  { %v190_v51 = vsel %vm189_vm6, %v179_v50, %v163_v33 }
 0x134   :  { %v191_v52 = vmul.f32 30.0, %v190_v51 }
 0x136   :  { %192 = vst [vmem:[#allocation2] sm:$0xff] %v191_v52 }
 0x137   :  { %328 = shalt.err (!%p325_p4)
}
 0x138   :  { %s329_s28 = scalar_lea.hbm %s467_s4, 128 }
 0x139   :  { %p330_p5 = scmp.ne.s32.totalorder %s467_s4, %s329_s28  ;;  %p333_p6 = scmp.lt.u32.totalorder %s329_s28, %s467_s4 }
 0x13b   :  { %p335_p7 = pnand %p333_p6, %p330_p5 }
 0x13d   :  { %338 = shalt.err (!%p335_p7)
}
 0x13e   :  { %202 = dma.vmem_to_hbm [thread:$0]  %s200_s1, 128, %s467_s4, [#allocation3]  }
 0x13f   :  { %339 = dma.done.wait [#allocation3], 128  }
 0x140   :  { %340 = vsyncadd [#allocation3], 4294967168 }
 0x141   :  { %206 = vsyncpa [#allocation3], 1 }

</bundles_post_ra>
